<compile_context>
chip_gen: v6e
topology: v6e:2x2x1
jax: 0.10.0
libtpu: 0.0.40
codegen_flags: <defaults>
</compile_context>

<pallas_src>
import functools

import jax
import jax.numpy as jnp
import numpy as np
from jax import lax
from jax.experimental import pallas as pl
from jax.experimental.pallas import tpu as pltpu


def _lane_mod(v, m):
    """v % m for a static python int m (bitwise-and when m is a power of 2)."""
    if m & (m - 1) == 0:
        return v & (m - 1)
    return v % m


def _esam_kernel(x_ref, w_ref, b_ref, o_ref, *, W, HW, use_vpu_mix):
    # x_ref block: (C, BW) with BW = images_per_block * H * W (lane-dense).
    C, BW = x_ref.shape
    x = x_ref[...].astype(jnp.float32)                       # (C, BW)

    # ---- lane-only boundary masks (computed once, broadcast over channels) --
    idx = lax.broadcasted_iota(jnp.int32, (1, BW), 1)
    p = idx if BW == HW else _lane_mod(idx, HW)               # pos within image
    col = _lane_mod(p, W)
    f32 = jnp.float32
    not_first_row = (p >= W).astype(f32)                      # (1, BW)
    not_last_row = (p < HW - W).astype(f32)
    not_first_col = (col != 0).astype(f32)
    not_last_col = (col != W - 1).astype(f32)

    # ---- 3x3 average pool (stride 1, zero pad 1, divisor always 9) ----------
    # Row shift == roll by W on the flattened axis; wrapped values (including
    # across image boundaries) always land on masked boundary positions.
    prev_h = pltpu.roll(x, shift=W, axis=1) * not_first_row
    next_h = pltpu.roll(x, shift=BW - W, axis=1) * not_last_row
    s_v = x + prev_h + next_h
    prev_w = pltpu.roll(s_v, shift=1, axis=1) * not_first_col
    next_w = pltpu.roll(s_v, shift=BW - 1, axis=1) * not_last_col
    avg = (s_v + prev_w + next_w) * (1.0 / 9.0)
    edge = x - avg                                            # (C, BW)

    # ---- 1x1 conv (BN folded in) + sigmoid gate + fused residual ------------
    w = w_ref[...].astype(jnp.float32)                        # (C, C)
    b = b_ref[...].astype(jnp.float32)                        # (C, 1)
    if use_vpu_mix:
        # Tiny C: unrolled VPU FMAs (overlap with XLU work; skip MXU latency).
        z = b
        for i in range(C):
            z = z + w[:, i:i + 1] * edge[i:i + 1, :]          # (C,1)*(1,BW)
    else:
        # Larger C: one wide MXU matmul at default precision.
        z = jnp.dot(w, edge, preferred_element_type=jnp.float32) + b
    wgt = jax.nn.sigmoid(z)

    # out = wgt * x + x  ==  x * (wgt + 1)
    o_ref[...] = (x * (wgt + 1.0)).astype(o_ref.dtype)


def esam_forward(x, conv_w, conv_b, bn_gamma, bn_beta, bn_mean, bn_var,
                 eps=1e-5, *, images_per_block=None, vpu_channel_mix_max=8):
    N, C, H, W = x.shape
    HW = H * W

    # Fold eval-mode BatchNorm into the 1x1 convolution on the host:
    #   BN(conv(e)) = (gamma/sqrt(var+eps)) * (W e + b - mean) + beta
    scale = (bn_gamma.astype(jnp.float32) /
             jnp.sqrt(bn_var.astype(jnp.float32) + eps))
    w_fold = conv_w.astype(jnp.float32) * scale[:, None]                # (C, C)
    b_fold = ((conv_b.astype(jnp.float32) - bn_mean.astype(jnp.float32))
              * scale + bn_beta.astype(jnp.float32)).reshape(C, 1)      # (C, 1)

    # Lane-dense layout: collapse the batch into the lane axis -> (C, N*HW).
    x_lanes = jnp.transpose(x, (1, 0, 2, 3)).reshape(C, N * HW)

    if images_per_block is None:
        # Largest divisor of N whose block working set (double-buffered I/O
        # plus ~8 live f32 temporaries) stays under a ~16 MiB budget, while
        # keeping the blocked lane dim a multiple of 128 (full extent is
        # always legal).
        itemsize = jnp.dtype(x.dtype).itemsize
        per_image = C * HW * (4 * itemsize + 8 * 4)
        cap = max(1, int((16 * 1024 * 1024) // max(per_image, 1)))
        images_per_block = N
        for d in range(min(N, cap), 0, -1):
            if N % d == 0 and (d == N or (d * HW) % 128 == 0):
                images_per_block = d
                break
    assert N % images_per_block == 0, "images_per_block must divide N"

    BW = images_per_block * HW
    grid = N // images_per_block
    use_vpu_mix = C <= vpu_channel_mix_max

    kernel = functools.partial(_esam_kernel, W=W, HW=HW,
                               use_vpu_mix=use_vpu_mix)
    out = pl.pallas_call(
        kernel,
        out_shape=jax.ShapeDtypeStruct((C, N * HW), x.dtype),
        grid=(grid,),
        in_specs=[
            pl.BlockSpec((C, BW), lambda g: (0, g)),
            pl.BlockSpec((C, C), lambda g: (0, 0)),
            pl.BlockSpec((C, 1), lambda g: (0, 0)),
        ],
        out_specs=pl.BlockSpec((C, BW), lambda g: (0, g)),
        compiler_params=pltpu.CompilerParams(
            dimension_semantics=("parallel",),
            # Explicit scoped-VMEM budget (v5e default is only 16 MiB).
            vmem_limit_bytes=32 * 1024 * 1024),
    )(x_lanes, w_fold, b_fold)
    return jnp.transpose(out.reshape(C, N, H, W), (1, 0, 2, 3))


def esam_ref(x, conv_w, conv_b, gamma, beta, mean, var, eps=1e-5):
    """Pure-JAX reference (mirrors the PyTorch module in eval mode)."""
    s = lax.reduce_window(x, 0.0, lax.add, (1, 1, 3, 3), (1, 1, 1, 1),
                          [(0, 0), (0, 0), (1, 1), (1, 1)])
    avg = s / 9.0                       # count_include_pad=True -> always /9
    edge = x - avg
    z = jnp.einsum("oi,nihw->nohw", conv_w, edge,
                   precision=lax.Precision.HIGHEST)
    z = z + conv_b[None, :, None, None]
    scale = (gamma / jnp.sqrt(var + eps))[None, :, None, None]
    y = (z - mean[None, :, None, None]) * scale + beta[None, :, None, None]
    wgt = jax.nn.sigmoid(y)
    return wgt * x + x


if __name__ == "__main__":
    key = jax.random.PRNGKey(0)
    N, C, H, W = 2, 4, 16, 16
    k1, k2, k3, k4, k5, k6, k7 = jax.random.split(key, 7)

    x = jax.random.normal(k1, (N, C, H, W), jnp.float32)
    # Conv2d(C, C, kernel_size=1) weight stored as (C_out, C_in); bias (C,)
    conv_w = 0.5 * jax.random.normal(k2, (C, C), jnp.float32)
    conv_b = 0.1 * jax.random.normal(k3, (C,), jnp.float32)
    # BatchNorm2d(C) parameters / running stats (eval mode)
    bn_gamma = 1.0 + 0.1 * jax.random.normal(k4, (C,), jnp.float32)
    bn_beta = 0.1 * jax.random.normal(k5, (C,), jnp.float32)
    bn_mean = 0.1 * jax.random.normal(k6, (C,), jnp.float32)
    bn_var = jnp.abs(jax.random.normal(k7, (C,), jnp.float32)) + 0.5

    out = esam_forward(x, conv_w, conv_b, bn_gamma, bn_beta, bn_mean, bn_var)
    out = jax.block_until_ready(out)

    ref = esam_ref(x, conv_w, conv_b, bn_gamma, bn_beta, bn_mean, bn_var)
    # Small-C path does the channel mix with exact f32 VPU FMAs, so the check
    # stays tight.  (The large-C MXU path uses default precision; loosen to
    # ~1e-2 if exercising that path.)
    np.testing.assert_allclose(np.asarray(out), np.asarray(ref),
                               rtol=1e-4, atol=1e-4)
    print("KERNEL_OK")
</pallas_src>

<mosaic_0001>
module attributes {stable_mosaic.version = 11 : i64} {
  func.func @_esam_kernel(%arg0: i32, %arg1: memref<4x512xf32, #tpu.memory_space<vmem>>, %arg2: memref<4x4xf32, #tpu.memory_space<vmem>>, %arg3: memref<4x1xf32, #tpu.memory_space<vmem>>, %arg4: memref<4x512xf32, #tpu.memory_space<vmem>>) attributes {dimension_semantics = [#tpu.dimension_semantics<parallel>], iteration_bounds = array<i64: 1>, scalar_prefetch = 0 : i64, scratch_operands = 0 : i64, tpu.core_type = #tpu.core_type<tc>, window_params = [{transform_indices = @transform_0, window_bounds = array<i64: 4, 512>}, {pipeline_mode = #tpu.pipeline_mode<synchronous>, transform_indices = @transform_1, window_bounds = array<i64: 4, 4>}, {pipeline_mode = #tpu.pipeline_mode<synchronous>, transform_indices = @transform_2, window_bounds = array<i64: 4, 1>}, {transform_indices = @transform_3, window_bounds = array<i64: 4, 512>}]} {
    %c0 = arith.constant 0 : index
    %c0_0 = arith.constant 0 : index
    %0 = vector.load %arg1[%c0, %c0_0] : memref<4x512xf32, #tpu.memory_space<vmem>>, vector<4x512xf32>
    %1 = tpu.iota {dimensions = array<i32: 1>} : vector<1x512xi32>
    %c255_i32 = arith.constant 255 : i32
    %2 = vector.broadcast %c255_i32 : i32 to vector<1x512xi32>
    %3 = arith.andi %1, %2 : vector<1x512xi32>
    %c15_i32 = arith.constant 15 : i32
    %4 = vector.broadcast %c15_i32 : i32 to vector<1x512xi32>
    %5 = arith.andi %3, %4 : vector<1x512xi32>
    %c16_i32 = arith.constant 16 : i32
    %6 = vector.broadcast %c16_i32 : i32 to vector<1x512xi32>
    %7 = arith.cmpi sge, %3, %6 : vector<1x512xi32>
    %8 = arith.extui %7 : vector<1x512xi1> to vector<1x512xi32>
    %9 = arith.sitofp %8 : vector<1x512xi32> to vector<1x512xf32>
    %c240_i32 = arith.constant 240 : i32
    %10 = vector.broadcast %c240_i32 : i32 to vector<1x512xi32>
    %11 = arith.cmpi slt, %3, %10 : vector<1x512xi32>
    %12 = arith.extui %11 : vector<1x512xi1> to vector<1x512xi32>
    %13 = arith.sitofp %12 : vector<1x512xi32> to vector<1x512xf32>
    %c0_i32 = arith.constant 0 : i32
    %14 = vector.broadcast %c0_i32 : i32 to vector<1x512xi32>
    %15 = arith.cmpi ne, %5, %14 : vector<1x512xi32>
    %16 = arith.extui %15 : vector<1x512xi1> to vector<1x512xi32>
    %17 = arith.sitofp %16 : vector<1x512xi32> to vector<1x512xf32>
    %c15_i32_1 = arith.constant 15 : i32
    %18 = vector.broadcast %c15_i32_1 : i32 to vector<1x512xi32>
    %19 = arith.cmpi ne, %5, %18 : vector<1x512xi32>
    %20 = arith.extui %19 : vector<1x512xi1> to vector<1x512xi32>
    %21 = arith.sitofp %20 : vector<1x512xi32> to vector<1x512xf32>
    %c16_i32_2 = arith.constant 16 : i32
    %22 = tpu.dynamic_rotate %0 by %c16_i32_2 dim 1 : vector<4x512xf32>, i32 -> vector<4x512xf32>
    %23 = vector.broadcast %9 : vector<1x512xf32> to vector<4x512xf32>
    %24 = arith.mulf %22, %23 : vector<4x512xf32>
    %c496_i32 = arith.constant 496 : i32
    %25 = tpu.dynamic_rotate %0 by %c496_i32 dim 1 : vector<4x512xf32>, i32 -> vector<4x512xf32>
    %26 = vector.broadcast %13 : vector<1x512xf32> to vector<4x512xf32>
    %27 = arith.mulf %25, %26 : vector<4x512xf32>
    %28 = arith.addf %0, %24 : vector<4x512xf32>
    %29 = arith.addf %28, %27 : vector<4x512xf32>
    %c1_i32 = arith.constant 1 : i32
    %30 = tpu.dynamic_rotate %29 by %c1_i32 dim 1 : vector<4x512xf32>, i32 -> vector<4x512xf32>
    %31 = vector.broadcast %17 : vector<1x512xf32> to vector<4x512xf32>
    %32 = arith.mulf %30, %31 : vector<4x512xf32>
    %c511_i32 = arith.constant 511 : i32
    %33 = tpu.dynamic_rotate %29 by %c511_i32 dim 1 : vector<4x512xf32>, i32 -> vector<4x512xf32>
    %34 = vector.broadcast %21 : vector<1x512xf32> to vector<4x512xf32>
    %35 = arith.mulf %33, %34 : vector<4x512xf32>
    %36 = arith.addf %29, %32 : vector<4x512xf32>
    %37 = arith.addf %36, %35 : vector<4x512xf32>
    %cst = arith.constant 0.111111112 : f32
    %38 = vector.broadcast %cst : f32 to vector<4x512xf32>
    %39 = arith.mulf %37, %38 : vector<4x512xf32>
    %40 = arith.subf %0, %39 : vector<4x512xf32>
    %c0_3 = arith.constant 0 : index
    %c0_4 = arith.constant 0 : index
    %41 = vector.load %arg2[%c0_3, %c0_4] : memref<4x4xf32, #tpu.memory_space<vmem>>, vector<4x4xf32>
    %c0_5 = arith.constant 0 : index
    %c0_6 = arith.constant 0 : index
    %42 = vector.load %arg3[%c0_5, %c0_6] : memref<4x1xf32, #tpu.memory_space<vmem>>, vector<4x1xf32>
    %43 = vector.extract_strided_slice %41 {offsets = [0, 0], sizes = [4, 1], strides = [1, 1]} : vector<4x4xf32> to vector<4x1xf32>
    %44 = vector.extract_strided_slice %40 {offsets = [0, 0], sizes = [1, 512], strides = [1, 1]} : vector<4x512xf32> to vector<1x512xf32>
    %45 = vector.broadcast %43 : vector<4x1xf32> to vector<4x512xf32>
    %46 = vector.broadcast %44 : vector<1x512xf32> to vector<4x512xf32>
    %47 = arith.mulf %45, %46 : vector<4x512xf32>
    %48 = vector.broadcast %42 : vector<4x1xf32> to vector<4x512xf32>
    %49 = arith.addf %48, %47 : vector<4x512xf32>
    %50 = vector.extract_strided_slice %41 {offsets = [0, 1], sizes = [4, 1], strides = [1, 1]} : vector<4x4xf32> to vector<4x1xf32>
    %51 = vector.extract_strided_slice %40 {offsets = [1, 0], sizes = [1, 512], strides = [1, 1]} : vector<4x512xf32> to vector<1x512xf32>
    %52 = vector.broadcast %50 : vector<4x1xf32> to vector<4x512xf32>
    %53 = vector.broadcast %51 : vector<1x512xf32> to vector<4x512xf32>
    %54 = arith.mulf %52, %53 : vector<4x512xf32>
    %55 = arith.addf %49, %54 : vector<4x512xf32>
    %56 = vector.extract_strided_slice %41 {offsets = [0, 2], sizes = [4, 1], strides = [1, 1]} : vector<4x4xf32> to vector<4x1xf32>
    %57 = vector.extract_strided_slice %40 {offsets = [2, 0], sizes = [1, 512], strides = [1, 1]} : vector<4x512xf32> to vector<1x512xf32>
    %58 = vector.broadcast %56 : vector<4x1xf32> to vector<4x512xf32>
    %59 = vector.broadcast %57 : vector<1x512xf32> to vector<4x512xf32>
    %60 = arith.mulf %58, %59 : vector<4x512xf32>
    %61 = arith.addf %55, %60 : vector<4x512xf32>
    %62 = vector.extract_strided_slice %41 {offsets = [0, 3], sizes = [4, 1], strides = [1, 1]} : vector<4x4xf32> to vector<4x1xf32>
    %63 = vector.extract_strided_slice %40 {offsets = [3, 0], sizes = [1, 512], strides = [1, 1]} : vector<4x512xf32> to vector<1x512xf32>
    %64 = vector.broadcast %62 : vector<4x1xf32> to vector<4x512xf32>
    %65 = vector.broadcast %63 : vector<1x512xf32> to vector<4x512xf32>
    %66 = arith.mulf %64, %65 : vector<4x512xf32>
    %67 = arith.addf %61, %66 : vector<4x512xf32>
    %68 = arith.negf %67 : vector<4x512xf32>
    %69 = math.exp %68 : vector<4x512xf32>
    %cst_7 = arith.constant 1.000000e+00 : f32
    %70 = vector.broadcast %cst_7 : f32 to vector<4x512xf32>
    %71 = arith.addf %70, %69 : vector<4x512xf32>
    %72 = arith.divf %70, %71 : vector<4x512xf32>
    %cst_8 = arith.constant 1.000000e+00 : f32
    %73 = vector.broadcast %cst_8 : f32 to vector<4x512xf32>
    %74 = arith.addf %72, %73 : vector<4x512xf32>
    %75 = arith.mulf %0, %74 : vector<4x512xf32>
    %c0_9 = arith.constant 0 : index
    %c0_10 = arith.constant 0 : index
    %76 = vector.load %arg4[%c0_9, %c0_10] : memref<4x512xf32, #tpu.memory_space<vmem>>, vector<4x512xf32>
    tpu.vector_store %arg4[%c0_9, %c0_10], %75 {strides = array<i32>} : memref<4x512xf32, #tpu.memory_space<vmem>>, vector<4x512xf32>,
    return
  }
  func.func @transform_0(%arg0: i32) -> (i32, i32) {
    %c0_i32 = arith.constant 0 : i32
    %c0_i32_0 = arith.constant 0 : i32
    return %c0_i32, %arg0 : i32, i32
  }
  func.func @transform_1(%arg0: i32) -> (i32, i32) {
    %c0_i32 = arith.constant 0 : i32
    %c0_i32_0 = arith.constant 0 : i32
    %c0_i32_1 = arith.constant 0 : i32
    return %c0_i32, %c0_i32_0 : i32, i32
  }
  func.func @transform_2(%arg0: i32) -> (i32, i32) {
    %c0_i32 = arith.constant 0 : i32
    %c0_i32_0 = arith.constant 0 : i32
    %c0_i32_1 = arith.constant 0 : i32
    return %c0_i32, %c0_i32_0 : i32, i32
  }
  func.func @transform_3(%arg0: i32) -> (i32, i32) {
    %c0_i32 = arith.constant 0 : i32
    %c0_i32_0 = arith.constant 0 : i32
    return %c0_i32, %arg0 : i32, i32
  }
}

</mosaic_0001>

<bundles_post_ra>
// kernel: tpu_custom_call.1
= control target key start
LH: loop header
LB: loop body
LE: loop exit
PB: predicated region body
PF: predicated region fallthrough
CT: control target
= control target key end

     0   :  { %8 = vsyncpa [#allocation3], 0  ;;  %s716_s0 = inlined_call_operand.hbm [shape: f32[4,512], index: 0, kind: input, shape index: {}]   ;;  %s717_s1 = inlined_call_operand.vmem [shape: f32[4,4], index: 1, kind: input, shape index: {}]   ;;  %s718_s2 = inlined_call_operand.vmem [shape: f32[4,1], index: 2, kind: input, shape index: {}]   ;;  %s719_s3 = inlined_call_operand.hbm [shape: f32[4,512], index: 3, kind: output, shape index: {}]  }
   0x1   :  { %9 = vsyncpa [#allocation4], 0  ;;  %s566_s12 = smov [#allocation2]  }
   0x2   :  { %s16_s13 = sshll.u32 %s566_s12, 4  ;;  %s17_s13 = int_to_ptr.vmem [resolvable:$true] %s16_s13 }
   0x3   :  { %s530_s14 = scalar_lea.vmem %s17_s13, 256  ;;  %p535_p1 = scmp.lt.s32.totalorder %s17_s13, %s17_s13 }
   0x4   :  { %p531_p0 = scmp.ne.s32.totalorder %s17_s13, %s530_s14  ;;  %p536_p2 = scmp.lt.s32.totalorder %s530_s14, %s530_s14 }
   0x6   :  { %p537_p3 = por %p536_p2, %p535_p1 }
   0x8   :  { %p538_p4 = pnand %p537_p3, %p531_p0 }
   0xa   :  { %541 = shalt.err (!%p538_p4)
}
   0xb   :  { %19 = dma.hbm_to_vmem [thread:$0]  %s716_s0, 256, %s17_s13, [#allocation3]  }
   0xc   :  { %562 = dma.done.wait [#allocation3], 256  }
   0xd   :  { %563 = vsyncadd [#allocation3], 4294967040  ;;  %v600_v0 = vld [vmem:[#allocation2 + $0x8] sm:$0xff]  ;;  %v602_v1 = vld [vmem:[#allocation2] sm:$0xff]  ;;  %s567_s17 = smov 16   ;;  %s568_s18 = smov 112   ;;  %v29_v5 = vlaneseq }
   0xe   :  { %100 = vrot.lane.b32.xlu1 %v600_v0, %s567_s17  ;;  %96 = vrot.lane.b32.xlu0 %v602_v1, %s567_s17  ;;  %v93_v2 = vcombine.high %v600_v0, %v600_v0  ;;  %v92_v3 = vcombine.high %v602_v1, %v602_v1  ;;  %v569_v4 = vmov 0   ;;  %v570_v18 = vmov 0.0   ;;  %s571_s0 = smov 1   ;;  %s572_s19 = smov 127   ;;  %v214_v49 = vld [vmem:[%s717_s1] sm:$0xf] }
   0xf   :  { %498 = vset.pattern.permute.xlu0 %v569_v4  ;;  %499 = vset.pattern.permute.xlu1 %v569_v4  ;;  %v613_v6 = vand.u32 127, %v29_v5  ;;  %v215_v50 = vld [vmem:[%s718_s2] sm:$0xf]  ;;  %v573_v51 = vmov 2   ;;  %v574_v52 = vmov 1   ;;  %v575_v53 = vmov 3  }
  0x10   :  { %s576_s1 = smov [#allocation5]  }
  0x11   :  { %v616_v7 = vadd.s32 256, %v613_v6  ;;  %v34_v10 = vand.u32 255, %v613_v6  ;;  %v621_v12 = vadd.s32 384, %v613_v6  ;;  %v624_v13 = vadd.s32 128, %v613_v6  ;;  %s462_s2 = sshll.u32 %s576_s1, 4  ;;  %s463_s2 = int_to_ptr.vmem [resolvable:$true] %s462_s2 }
  0x12   :  { %102 = vrot.lane.b32.xlu1 %v93_v2, %s567_s17  ;;  %113 = vrot.lane.b32.xlu0 %v602_v1, %s568_s18  ;;  %vm104_vm0 = vcmp.lt.s32.totalorder %v613_v6, 16  ;;  %vm121_vm5 = vcmp.lt.s32.totalorder %v613_v6, 112  ;;  %vm164_vm8 = vcmp.lt.s32.totalorder %v613_v6, 1  ;;  %vm181_vm12 = vcmp.lt.s32.totalorder %v613_v6, 127  ;;  %s542_s24 = scalar_lea.vmem %s463_s2, 256  ;;  %p547_p6 = scmp.lt.s32.totalorder %s463_s2, %s463_s2 }
  0x13   :  { %v36_v11 = vand.u32 255, %v616_v7  ;;  %vm42_vm1 = vcmp.ge.s32.totalorder %v34_v10, 16  ;;  %v37_v16 = vand.u32 255, %v621_v12  ;;  %v35_v17 = vand.u32 255, %v624_v13  ;;  %p543_p5 = scmp.ne.s32.totalorder %s463_s2, %s542_s24  ;;  %p548_p7 = scmp.lt.s32.totalorder %s542_s24, %s542_s24 }
  0x14   :  { %v471_v19 = vsel %vm42_vm1, 1.0, %v570_v18  ;;  %v38_v54 = vand.u32 15, %v34_v10 }
  0x15   :  { %vm44_vm2 = vcmp.ge.s32.totalorder %v36_v11, 16  ;;  %vm57_vm3 = vcmp.lt.s32.totalorder %v37_v16, 240  ;;  %vm55_vm4 = vcmp.lt.s32.totalorder %v35_v17, 240  ;;  %v39_v55 = vand.u32 15, %v35_v17  ;;  %p549_p8 = por %p548_p7, %p547_p6 }
  0x16   :  { %115 = vrot.lane.b32.xlu1 %v92_v3, %s568_s18  ;;  %98 = vrot.lane.b32.xlu0 %v92_v3, %s567_s17  ;;  %v472_v21 = vsel %vm44_vm2, 1.0, %v570_v18  ;;  %v474_v28 = vsel %vm57_vm3, 1.0, %v570_v18  ;;  %v473_v29 = vsel %vm55_vm4, 1.0, %v570_v18  ;;  %v41_v57 = vand.u32 15, %v37_v16 }
  0x17   :  { %v40_v59 = vand.u32 15, %v36_v11  ;;  %vm66_vm6 = vcmp.ne.s32.totalorder %v38_v54, 0  ;;  %vm67_vm7 = vcmp.ne.s32.totalorder %v39_v55, 0  ;;  %vm78_vm11 = vcmp.ne.s32.totalorder %v38_v54, 15  ;;  %p550_p9 = pnand %p549_p8, %p543_p5 }
  0x18   :  { %vm69_vm9 = vcmp.ne.s32.totalorder %v41_v57, 0  ;;  %v475_v61 = vsel %vm66_vm6, 1.0, %v570_v18  ;;  %v476_v62 = vsel %vm67_vm7, 1.0, %v570_v18  ;;  %vm79_vm13 = vcmp.ne.s32.totalorder %v39_v55, 15 }
  0x19   :  { %vm68_vm10 = vcmp.ne.s32.totalorder %v40_v59, 0  ;;  %v478_v3 = vsel %vm69_vm9, 1.0, %v570_v18  ;;  %vm80_vm14 = vcmp.ne.s32.totalorder %v40_v59, 15  ;;  %vm81_vm15 = vcmp.ne.s32.totalorder %v41_v57, 15 }
  0x1a   :  { %119 = vrot.lane.b32.xlu1 %v93_v2, %s568_s18  ;;  %117 = vrot.lane.b32.xlu0 %v600_v0, %s568_s18  ;;  %v477_v10 = vsel %vm68_vm10, 1.0, %v570_v18  ;;  %v480_v17 = vsel %vm79_vm13, 1.0, %v570_v18 }
  0x80   :  { %v101_v8 = vpop.permute.xlu1 %100  ;;  %v97_v9 = vpop.permute.xlu0 %96 }
  0x84   :  { %v103_v14 = vpop.permute.xlu1 %102  ;;  %v114_v15 = vpop.permute.xlu0 %113 }
  0x85   :  { %v108_v20 = vsel %vm104_vm0, %v103_v14, %v97_v9  ;;  %v105_v33 = vsel %vm104_vm0, %v101_v8, %v103_v14 }
  0x86   :  { %v109_v26 = vmul.f32 %v471_v19, %v108_v20 }
  0x88   :  { %v116_v22 = vpop.permute.xlu1 %115  ;;  %v99_v23 = vpop.permute.xlu0 %98 }
  0x89   :  { %v106_v24 = vsel %vm104_vm0, %v99_v23, %v101_v8  ;;  %v107_v25 = vsel %vm104_vm0, %v97_v9, %v99_v23  ;;  %v124_v39 = vsel %vm121_vm5, %v114_v15, %v116_v22  ;;  %v481_v23 = vsel %vm80_vm14, 1.0, %v570_v18 }
  0x8a   :  { %v111_v27 = vmul.f32 %v472_v21, %v106_v24  ;;  %v134_v30 = vcombine.low %v109_v26, %v107_v25  ;;  %v482_v24 = vsel %vm81_vm15, 1.0, %v570_v18 }
  0x8c   :  { %v120_v31 = vpop.permute.xlu1 %119  ;;  %v118_v32 = vpop.permute.xlu0 %117  ;;  %v135_v36 = vcombine.low %v111_v27, %v105_v33  ;;  %v138_v41 = vadd.f32 %v134_v30, %v602_v1 }
  0x8d   :  { %v125_v34 = vsel %vm121_vm5, %v120_v31, %v114_v15  ;;  %v123_v35 = vsel %vm121_vm5, %v116_v22, %v118_v32  ;;  %v122_v40 = vsel %vm121_vm5, %v118_v32, %v120_v31  ;;  %v479_v15 = vsel %vm78_vm11, 1.0, %v570_v18 }
  0x8e   :  { %v129_v37 = vmul.f32 %v474_v28, %v125_v34  ;;  %v127_v38 = vmul.f32 %v473_v29, %v123_v35  ;;  %v139_v44 = vadd.f32 %v135_v36, %v600_v0  ;;  %v693_v29 = vshrl.u32 %v29_v5, 7 }
  0x90   :  { %v144_v42 = vcombine.low %v124_v39, %v127_v38  ;;  %v145_v43 = vcombine.low %v122_v40, %v129_v37  ;;  %v225_v5 = vsub.s32 0, %v693_v29  ;;  %v229_v40 = vsub.s32 4, %v693_v29 }
  0x91   :  { %v330_v6 = vsub.s32 6, %v693_v29 }
  0x92   :  { %v648_v45 = vadd.f32 %v144_v42, %v138_v41  ;;  %v650_v46 = vadd.f32 %v145_v43, %v139_v44  ;;  %v326_v41 = vsub.s32 2, %v693_v29  ;;  %v278_v44 = vsub.s32 1, %v693_v29 }
  0x94   :  { %156 = vrot.lane.b32.xlu0 %v648_v45, %s571_s0  ;;  %v152_v47 = vcombine.high %v648_v45, %v648_v45  ;;  %v153_v48 = vcombine.high %v650_v46, %v650_v46 }
  0x96   :  { %158 = vrot.lane.b32.xlu1 %v152_v47, %s571_s0 }
  0x98   :  { %160 = vrot.lane.b32.xlu0 %v650_v46, %s571_s0 }
  0x9a   :  { %162 = vrot.lane.b32.xlu1 %v153_v48, %s571_s0 }
  0x9c   :  { %173 = vrot.lane.b32.xlu0 %v648_v45, %s572_s19 }
  0x9e   :  { %175 = vrot.lane.b32.xlu1 %v152_v47, %s572_s19 }
  0xa0   :  { %177 = vrot.lane.b32.xlu0 %v650_v46, %s572_s19 }
  0xa2   :  { %179 = vrot.lane.b32.xlu1 %v153_v48, %s572_s19 }
  0xa4   :  { %218 = vperm.xlu0 %498, %v214_v49  }
  0xa6   :  { %265 = vperm.xlu1 %499, %v215_v50  }
  0xa8   :  { %501 = vset.pattern.permute.xlu0 %v573_v51 }
  0xa9   :  { %321 = vperm.xlu0 %501, %v214_v49  }
  0xaa   :  { %500 = vset.pattern.permute.xlu1 %v574_v52  ;;  %v374_v52 = vsub.s32 3, %v693_v29 }
  0xab   :  { %273 = vperm.xlu1 %500, %v214_v49  }
  0xad   :  { %503 = vset.pattern.permute.xlu0 %v575_v53 }
  0xaf   :  { %502 = vset.pattern.permute.xlu1 %v575_v53  ;;  %v378_v53 = vsub.s32 7, %v693_v29 }
  0xb0   :  { %369 = vperm.xlu1 %502, %v214_v49  }
 0x106   :  { %v157_v56 = vpop.permute.xlu0 %156 }
 0x108   :  { %v159_v58 = vpop.permute.xlu1 %158 }
 0x109   :  { %v167_v2 = vsel %vm164_vm8, %v157_v56, %v159_v58 }
 0x10a   :  { %v161_v60 = vpop.permute.xlu0 %160  ;;  %v170_v12 = vmul.f32 %v476_v62, %v167_v2 }
 0x10b   :  { %v166_v11 = vsel %vm164_vm8, %v159_v58, %v161_v60 }
 0x10c   :  { %v163_v63 = vpop.permute.xlu1 %162  ;;  %v171_v19 = vmul.f32 %v477_v10, %v166_v11 }
 0x10d   :  { %v165_v4 = vsel %vm164_vm8, %v161_v60, %v163_v63  ;;  %v168_v7 = vsel %vm164_vm8, %v163_v63, %v157_v56 }
 0x10e   :  { %v169_v8 = vmul.f32 %v475_v61, %v168_v7  ;;  %v174_v9 = vpop.permute.xlu0 %173  ;;  %v172_v13 = vmul.f32 %v478_v3, %v165_v4 }
 0x110   :  { %v176_v14 = vpop.permute.xlu1 %175  ;;  %v194_v20 = vcombine.low %v169_v8, %v170_v12  ;;  %v195_v25 = vcombine.low %v171_v19, %v172_v13 }
 0x111   :  { %v184_v16 = vsel %vm181_vm12, %v174_v9, %v176_v14 }
 0x112   :  { %v178_v21 = vpop.permute.xlu0 %177  ;;  %v186_v26 = vmul.f32 %v479_v15, %v184_v16  ;;  %v198_v32 = vadd.f32 %v194_v20, %v648_v45  ;;  %v199_v18 = vadd.f32 %v195_v25, %v650_v46  ;;  %v282_v45 = vsub.s32 5, %v693_v29 }
 0x113   :  { %v183_v22 = vsel %vm181_vm12, %v176_v14, %v178_v21 }
 0x114   :  { %v187_v27 = vmul.f32 %v480_v17, %v183_v22  ;;  %v180_v28 = vpop.permute.xlu1 %179 }
 0x115   :  { %v182_v30 = vsel %vm181_vm12, %v178_v21, %v180_v28  ;;  %v185_v31 = vsel %vm181_vm12, %v180_v28, %v174_v9 }
 0x116   :  { %v204_v33 = vcombine.low %v186_v26, %v187_v27  ;;  %v188_v34 = vmul.f32 %v481_v23, %v182_v30  ;;  %v189_v35 = vmul.f32 %v482_v24, %v185_v31 }
 0x118   :  { %v208_v36 = vadd.f32 %v204_v33, %v198_v32  ;;  %v205_v37 = vcombine.low %v188_v34, %v189_v35 }
 0x11a   :  { %v210_v38 = vmul.f32 0.11111111, %v208_v36  ;;  %v209_v39 = vadd.f32 %v205_v37, %v199_v18 }
 0x11c   :  { %v212_v42 = vsub.f32 %v602_v1, %v210_v38  ;;  %v211_v43 = vmul.f32 0.11111111, %v209_v39 }
 0x11e   :  { %v213_v46 = vsub.f32 %v600_v0, %v211_v43  ;;  %v226_v47 = vrot.slane %v212_v42, %v225_v5  ;;  %v230_v48 = vrot.slane %v212_v42, %v229_v40  ;;  %v327_v50 = vrot.slane %v212_v42, %v326_v41 }
 0x11f   :  { %v219_v49 = vpop.permute.xlu0 %218  ;;  %v331_v51 = vrot.slane %v212_v42, %v330_v6  ;;  %v279_v61 = vrot.slane %v212_v42, %v278_v44  ;;  %v283_v62 = vrot.slane %v212_v42, %v282_v45  ;;  %v375_v10 = vrot.slane %v212_v42, %v374_v52 }
 0x120   :  { %v234_v54 = vrot.slane %v213_v46, %v225_v5  ;;  %v238_v55 = vrot.slane %v213_v46, %v229_v40  ;;  %v246_v56 = vrot.slane %v226_v47, %v225_v5  ;;  %v250_v57 = vrot.slane %v230_v48, %v225_v5 }
 0x121   :  { %v266_v58 = vpop.permute.xlu1 %265  ;;  %v335_v59 = vrot.slane %v213_v46, %v326_v41  ;;  %v339_v60 = vrot.slane %v213_v46, %v330_v6  ;;  %v347_v7 = vrot.slane %v327_v50, %v326_v41  ;;  %v287_v8 = vrot.slane %v213_v46, %v278_v44 }
 0x122   :  { %v254_v63 = vrot.slane %v234_v54, %v225_v5  ;;  %v258_v2 = vrot.slane %v238_v55, %v225_v5  ;;  %v259_v3 = vmul.f32 %v246_v56, %v219_v49  ;;  %v260_v4 = vmul.f32 %v250_v57, %v219_v49 }
 0x123   :  { %v291_v9 = vrot.slane %v213_v46, %v282_v45  ;;  %v351_v14 = vrot.slane %v331_v51, %v326_v41  ;;  %v355_v15 = vrot.slane %v335_v59, %v326_v41  ;;  %v359_v19 = vrot.slane %v339_v60, %v326_v41 }
 0x124   :  { %v261_v11 = vmul.f32 %v254_v63, %v219_v49  ;;  %v262_v12 = vmul.f32 %v258_v2, %v219_v49  ;;  %v322_v13 = vpop.permute.xlu0 %321  ;;  %v268_v16 = vadd.f32 %v266_v58, %v259_v3  ;;  %v269_v17 = vadd.f32 %v266_v58, %v260_v4 }
 0x125   :  { %v360_v20 = vmul.f32 %v347_v7, %v322_v13  ;;  %v299_v23 = vrot.slane %v279_v61, %v278_v44  ;;  %v303_v24 = vrot.slane %v283_v62, %v278_v44  ;;  %v307_v26 = vrot.slane %v287_v8, %v278_v44 }
 0x126   :  { %v270_v21 = vadd.f32 %v266_v58, %v261_v11  ;;  %v271_v22 = vadd.f32 %v266_v58, %v262_v12  ;;  %v274_v25 = vpop.permute.xlu1 %273  ;;  %v311_v27 = vrot.slane %v291_v9, %v278_v44  ;;  %v379_v28 = vrot.slane %v212_v42, %v378_v53 }
 0x127   :  { %v383_v29 = vrot.slane %v213_v46, %v374_v52  ;;  %v361_v30 = vmul.f32 %v351_v14, %v322_v13  ;;  %v312_v31 = vmul.f32 %v299_v23, %v274_v25  ;;  %v313_v32 = vmul.f32 %v303_v24, %v274_v25 }
 0x128   :  { %v387_v33 = vrot.slane %v213_v46, %v378_v53  ;;  %v362_v34 = vmul.f32 %v355_v15, %v322_v13  ;;  %v363_v35 = vmul.f32 %v359_v19, %v322_v13  ;;  %v314_v18 = vmul.f32 %v307_v26, %v274_v25 }
 0x129   :  { %v315_v36 = vmul.f32 %v311_v27, %v274_v25  ;;  %v316_v37 = vadd.f32 %v312_v31, %v268_v16  ;;  %v317_v38 = vadd.f32 %v313_v32, %v269_v17  ;;  %v395_v39 = vrot.slane %v375_v10, %v374_v52 }
 0x12a   :  { %v399_v5 = vrot.slane %v379_v28, %v374_v52  ;;  %v318_v40 = vadd.f32 %v314_v18, %v270_v21  ;;  %v403_v6 = vrot.slane %v383_v29, %v374_v52  ;;  %v407_v43 = vrot.slane %v387_v33, %v374_v52 }
 0x12b   :  { %v319_v41 = vadd.f32 %v315_v36, %v271_v22  ;;  %v370_v45 = vpop.permute.xlu1 %369  ;;  %v364_v44 = vadd.f32 %v360_v20, %v316_v37  ;;  %v365_v42 = vadd.f32 %v361_v30, %v317_v38 }
 0x12c   :  { %v408_v47 = vmul.f32 %v395_v39, %v370_v45  ;;  %v409_v48 = vmul.f32 %v399_v5, %v370_v45  ;;  %v366_v49 = vadd.f32 %v362_v34, %v318_v40  ;;  %v410_v46 = vmul.f32 %v403_v6, %v370_v45 }
 0x12d   :  { %v367_v50 = vadd.f32 %v363_v35, %v319_v41  ;;  %v411_v51 = vmul.f32 %v407_v43, %v370_v45 }
 0x12e   :  { %v412_v53 = vadd.f32 %v408_v47, %v364_v44  ;;  %v413_v54 = vadd.f32 %v409_v48, %v365_v42  ;;  %v414_v55 = vadd.f32 %v410_v46, %v366_v49 }
 0x12f   :  { %v415_v56 = vadd.f32 %v411_v51, %v367_v50 }
 0x130   :  { %v483_v57 = vmul.f32 -1.442695, %v412_v53  ;;  %v484_v58 = vmul.f32 -1.442695, %v413_v54  ;;  %v485_v59 = vmul.f32 -1.442695, %v414_v55 }
 0x131   :  { %v486_v60 = vmul.f32 -1.442695, %v415_v56 }
 0x132   :  { %506 = vpow2.f32 %v483_v57 }
 0x133   :  { %508 = vpow2.f32 %v484_v58 }
 0x134   :  { %510 = vpow2.f32 %v485_v59 }
 0x135   :  { %512 = vpow2.f32 %v486_v60 }
 0x13f   :  { %v507_v52 = vpop.eup %506 }
 0x140   :  { %v509_v61 = vpop.eup %508  ;;  %v428_v62 = vadd.f32 1.0, %v507_v52 }
 0x141   :  { %v511_v63 = vpop.eup %510  ;;  %v429_v2 = vadd.f32 1.0, %v509_v61 }
 0x142   :  { %v513_v3 = vpop.eup %512  ;;  %v430_v4 = vadd.f32 1.0, %v511_v63  ;;  %514 = vrcp.f32 %v428_v62 }
 0x143   :  { %v431_v7 = vadd.f32 1.0, %v513_v3  ;;  %516 = vrcp.f32 %v429_v2 }
 0x144   :  { %518 = vrcp.f32 %v430_v4 }
 0x145   :  { %520 = vrcp.f32 %v431_v7 }
 0x14f   :  { %v515_v8 = vpop.eup %514 }
 0x150   :  { %v517_v9 = vpop.eup %516  ;;  %v440_v10 = vadd.f32 1.0, %v515_v8 }
 0x151   :  { %v519_v11 = vpop.eup %518  ;;  %v441_v12 = vadd.f32 1.0, %v517_v9 }
 0x152   :  { %v521_v13 = vpop.eup %520  ;;  %v442_v14 = vadd.f32 1.0, %v519_v11 }
 0x153   :  { %v443_v15 = vadd.f32 1.0, %v521_v13  ;;  %v448_v16 = vcombine.low %v440_v10, %v441_v12 }
 0x155   :  { %v449_v17 = vcombine.low %v442_v14, %v443_v15  ;;  %v452_v19 = vmul.f32 %v448_v16, %v602_v1 }
 0x157   :  { %v453_v20 = vmul.f32 %v449_v17, %v600_v0  ;;  %454 = vst [vmem:[#allocation5] sm:$0xff] %v452_v19 }
 0x159   :  { %455 = vst [vmem:[#allocation5 + $0x8] sm:$0xff] %v453_v20 }
 0x15a   :  { %553 = shalt.err (!%p550_p9)
}
 0x15b   :  { %465 = dma.vmem_to_hbm [thread:$0]  %s463_s2, 256, %s719_s3, [#allocation4]  }
 0x15c   :  { %564 = dma.done.wait [#allocation4], 256  }
 0x15d   :  { %565 = vsyncadd [#allocation4], 4294967040 }
 0x15e   :  { %469 = vsyncpa [#allocation3], 1 }
 0x15f   :  { %470 = vsyncpa [#allocation4], 1 }

</bundles_post_ra>
